<compile_context>
chip_gen: v7x
topology: tpu7x:2x2x1
jax: 0.10.0
libtpu: 0.0.40
codegen_flags: <defaults>
</compile_context>

<pallas_src>
import functools

import jax
import jax.numpy as jnp
from jax.experimental import pallas as pl
from jax.experimental.pallas import tpu as pltpu


def _round_up(n: int, m: int) -> int:
    return ((n + m - 1) // m) * m


def _make_mlp_kernel(n_layers: int):
    """Straight-line fused MLP body: n_layers matmuls, tanh on all but the last."""

    def kernel(x_ref, *refs):
        w_refs = refs[:n_layers]
        o_ref = refs[n_layers]
        h = x_ref[...]
        for li in range(n_layers):
            acc = jnp.dot(h, w_refs[li][...], preferred_element_type=jnp.float32)
            if li != n_layers - 1:
                acc = jnp.tanh(acc)                # activation on the f32 accumulator (EUP)
                h = acc.astype(w_refs[li].dtype)   # feed next MXU pass in I/O dtype
            else:
                h = acc
        o_ref[...] = h.astype(o_ref.dtype)

    return kernel


def prepare_mlpnet_weights(weights, dtype=None):
    """PyTorch nn.Linear weights (out,in) -> (in,out).  Call ONCE and reuse across calls."""
    ws = []
    for w in weights:
        w = jnp.asarray(w)
        if dtype is not None:
            w = w.astype(dtype)
        ws.append(w.T)
    return tuple(ws)


def _vmem_bytes(bt: int, dims, itemsize: int) -> int:
    """Rough VMEM footprint: double-buffered I/O tiles + resident weights + f32 temps."""
    io_tiles = 2 * bt * (dims[0] + dims[-1]) * itemsize
    weights = 2 * sum(dims[i] * dims[i + 1] for i in range(len(dims) - 1)) * itemsize
    interms = 2 * bt * max(dims) * 4
    return io_tiles + weights + interms


@functools.partial(jax.jit, static_argnames=("batch_tile", "vmem_limit"))
def _mlpnet_call(x, *ws, batch_tile: int, vmem_limit: int):
    B, F = x.shape
    n_layers = len(ws)
    dims = [F] + [int(w.shape[1]) for w in ws]

    # x tile: true (unpadded) feature width -> no HBM read inflation
    in_specs = [pl.BlockSpec((batch_tile, dims[0]), lambda i: (i, 0))]
    for li in range(n_layers):
        # whole (untiled) weight resident in VMEM every grid step (constant index_map)
        # TODO(synk): pipeline_mode=pl.Buffered(1) would halve resident-weight VMEM for
        #             very wide hidden layers; omitted here to keep lowering conservative.
        in_specs.append(pl.BlockSpec((dims[li], dims[li + 1]), lambda i: (0, 0)))
    # output at true n_emb width -> no HBM write inflation, no post-slice
    out_spec = pl.BlockSpec((batch_tile, dims[-1]), lambda i: (i, 0))

    return pl.pallas_call(
        _make_mlp_kernel(n_layers),
        out_shape=jax.ShapeDtypeStruct((B, dims[-1]), x.dtype),
        grid_spec=pltpu.PrefetchScalarGridSpec(
            num_scalar_prefetch=0,
            grid=(pl.cdiv(B, batch_tile),),      # ragged tail handled by Pallas edge masking
            in_specs=in_specs,
            out_specs=out_spec,
        ),
        compiler_params=pltpu.CompilerParams(
            dimension_semantics=("parallel",),   # batch tiles independent (megacore / 2-TC)
            vmem_limit_bytes=vmem_limit,
        ),
    )(x, *ws)


def mlpnet_forward(x, prepared_ws, *, batch_tile=1024):
    """MLPnet forward.

    x:           (batch, n_features)
    prepared_ws: tuple from prepare_mlpnet_weights() -- (in_features, out_features) each.
    """
    x = jnp.asarray(x)
    B, F = x.shape
    dims = [F] + [int(w.shape[1]) for w in prepared_ws]
    for i, w in enumerate(prepared_ws):
        assert int(w.shape[0]) == dims[i], "weight in_features mismatch"

    itemsize = jnp.dtype(x.dtype).itemsize
    sub = {4: 8, 2: 16, 1: 32}.get(itemsize, 8)          # sublane packing for the I/O dtype

    # batch tile: sublane-aligned, no larger than needed, shrunk to fit a v7x-safe budget
    bt = max(sub, _round_up(min(batch_tile, B), sub))
    budget = 48 * 2**20
    while bt > sub and _vmem_bytes(bt, dims, itemsize) > budget:
        bt = max(sub, _round_up(bt // 2, sub))
    vmem_limit = int(min(64 * 2**20,
                         max(32 * 2**20, int(1.5 * _vmem_bytes(bt, dims, itemsize)))))

    return _mlpnet_call(x, *prepared_ws, batch_tile=bt, vmem_limit=vmem_limit)


def mlpnet_ref(x, torch_weights):
    """Pure-JAX (f32) reference matching the PyTorch module (bias=False, tanh)."""
    h = jnp.asarray(x, jnp.float32)
    n_layers = len(torch_weights)
    for i, w in enumerate(torch_weights):
        h = h @ jnp.asarray(w, jnp.float32).T
        if i != n_layers - 1:
            h = jnp.tanh(h)
    return h


if __name__ == "__main__":
    # Small config consistent with MLPnet(n_features, n_hidden=[...], n_emb=...)
    batch, n_features = 32, 16
    n_hidden, n_emb = (64, 32), 8

    key = jax.random.PRNGKey(0)
    keys = jax.random.split(key, 1 + len(n_hidden) + 1)

    x = jax.random.normal(keys[0], (batch, n_features), dtype=jnp.float32)

    dims = [n_features] + list(n_hidden) + [n_emb]
    torch_weights = []
    for i in range(len(dims) - 1):
        w = jax.random.normal(keys[i + 1], (dims[i + 1], dims[i]), dtype=jnp.float32)
        torch_weights.append(w / jnp.sqrt(jnp.float32(dims[i])))

    ref = mlpnet_ref(x, torch_weights)

    # f32 I/O path (weights prepared once, reused) — tight check against the reference
    ws_f32 = prepare_mlpnet_weights(torch_weights)
    out = jax.block_until_ready(mlpnet_forward(x, ws_f32))
    assert out.shape == (batch, n_emb)
    err = float(jnp.max(jnp.abs(out - ref)))
    assert err < 1e-4, f"f32 max abs err {err}"

    # bf16 HBM I/O path (f32 accumulation inside the kernel) — loose check
    ws_bf16 = prepare_mlpnet_weights(torch_weights, dtype=jnp.bfloat16)
    out_bf16 = jax.block_until_ready(mlpnet_forward(x.astype(jnp.bfloat16), ws_bf16))
    err_bf16 = float(jnp.max(jnp.abs(out_bf16.astype(jnp.float32) - ref)))
    assert err_bf16 < 1e-1, f"bf16 max abs err {err_bf16}"

    print("KERNEL_OK")
</pallas_src>

<mosaic_0001>
module attributes {stable_mosaic.version = 11 : i64} {
  func.func @kernel(%arg0: i32, %arg1: memref<32x16xf32, #tpu.memory_space<vmem>>, %arg2: memref<16x64xf32, #tpu.memory_space<vmem>>, %arg3: memref<64x32xf32, #tpu.memory_space<vmem>>, %arg4: memref<32x8xf32, #tpu.memory_space<vmem>>, %arg5: memref<32x8xf32, #tpu.memory_space<vmem>>) attributes {dimension_semantics = [#tpu.dimension_semantics<parallel>], iteration_bounds = array<i64: 1>, scalar_prefetch = 0 : i64, scratch_operands = 0 : i64, tpu.core_type = #tpu.core_type<tc>, window_params = [{transform_indices = @transform_0, window_bounds = array<i64: 32, 16>}, {pipeline_mode = #tpu.pipeline_mode<synchronous>, transform_indices = @transform_1, window_bounds = array<i64: 16, 64>}, {pipeline_mode = #tpu.pipeline_mode<synchronous>, transform_indices = @transform_2, window_bounds = array<i64: 64, 32>}, {pipeline_mode = #tpu.pipeline_mode<synchronous>, transform_indices = @transform_3, window_bounds = array<i64: 32, 8>}, {transform_indices = @transform_4, window_bounds = array<i64: 32, 8>}]} {
    %c0 = arith.constant 0 : index
    %c0_0 = arith.constant 0 : index
    %0 = vector.load %arg1[%c0, %c0_0] : memref<32x16xf32, #tpu.memory_space<vmem>>, vector<32x16xf32>
    %c0_1 = arith.constant 0 : index
    %c0_2 = arith.constant 0 : index
    %1 = vector.load %arg2[%c0_1, %c0_2] : memref<16x64xf32, #tpu.memory_space<vmem>>, vector<16x64xf32>
    %cst = arith.constant dense<0.000000e+00> : vector<32x64xf32>
    %2 = tpu.matmul %0, %1, %cst {dimension_numbers = #tpu.dot_dimension_numbers<[1], [0], [0], [1], [0, 0, 1, 1], [], []>} : vector<32x16xf32>, vector<16x64xf32>, vector<32x64xf32> -> vector<32x64xf32>
    %3 = math.tanh %2 : vector<32x64xf32>
    %c0_3 = arith.constant 0 : index
    %c0_4 = arith.constant 0 : index
    %4 = vector.load %arg3[%c0_3, %c0_4] : memref<64x32xf32, #tpu.memory_space<vmem>>, vector<64x32xf32>
    %cst_5 = arith.constant dense<0.000000e+00> : vector<32x32xf32>
    %5 = tpu.matmul %3, %4, %cst_5 {dimension_numbers = #tpu.dot_dimension_numbers<[1], [0], [0], [1], [0, 0, 1, 1], [], []>} : vector<32x64xf32>, vector<64x32xf32>, vector<32x32xf32> -> vector<32x32xf32>
    %6 = math.tanh %5 : vector<32x32xf32>
    %c0_6 = arith.constant 0 : index
    %c0_7 = arith.constant 0 : index
    %7 = vector.load %arg4[%c0_6, %c0_7] : memref<32x8xf32, #tpu.memory_space<vmem>>, vector<32x8xf32>
    %cst_8 = arith.constant dense<0.000000e+00> : vector<32x8xf32>
    %8 = tpu.matmul %6, %7, %cst_8 {dimension_numbers = #tpu.dot_dimension_numbers<[1], [0], [0], [1], [0, 0, 1, 1], [], []>} : vector<32x32xf32>, vector<32x8xf32>, vector<32x8xf32> -> vector<32x8xf32>
    %c0_9 = arith.constant 0 : index
    %c0_10 = arith.constant 0 : index
    %9 = vector.load %arg5[%c0_9, %c0_10] : memref<32x8xf32, #tpu.memory_space<vmem>>, vector<32x8xf32>
    tpu.vector_store %arg5[%c0_9, %c0_10], %8 {strides = array<i32>} : memref<32x8xf32, #tpu.memory_space<vmem>>, vector<32x8xf32>,
    return
  }
  func.func @transform_0(%arg0: i32) -> (i32, i32) {
    %c0_i32 = arith.constant 0 : i32
    %c0_i32_0 = arith.constant 0 : i32
    return %arg0, %c0_i32 : i32, i32
  }
  func.func @transform_1(%arg0: i32) -> (i32, i32) {
    %c0_i32 = arith.constant 0 : i32
    %c0_i32_0 = arith.constant 0 : i32
    %c0_i32_1 = arith.constant 0 : i32
    return %c0_i32, %c0_i32_0 : i32, i32
  }
  func.func @transform_2(%arg0: i32) -> (i32, i32) {
    %c0_i32 = arith.constant 0 : i32
    %c0_i32_0 = arith.constant 0 : i32
    %c0_i32_1 = arith.constant 0 : i32
    return %c0_i32, %c0_i32_0 : i32, i32
  }
  func.func @transform_3(%arg0: i32) -> (i32, i32) {
    %c0_i32 = arith.constant 0 : i32
    %c0_i32_0 = arith.constant 0 : i32
    %c0_i32_1 = arith.constant 0 : i32
    return %c0_i32, %c0_i32_0 : i32, i32
  }
  func.func @transform_4(%arg0: i32) -> (i32, i32) {
    %c0_i32 = arith.constant 0 : i32
    %c0_i32_0 = arith.constant 0 : i32
    return %arg0, %c0_i32 : i32, i32
  }
}

</mosaic_0001>

<bundles_post_ra>
// kernel: _mlpnet_call.1
= control target key start
LH: loop header
LB: loop body
LE: loop exit
PB: predicated region body
PF: predicated region fallthrough
CT: control target
= control target key end

     0   :  { %vm23_vm0 = vcmask 130048   ;;  %vm133_vm1 = vcmask 523264   ;;  %vm239_vm2 = vcmask 261120   ;;  %vm337_vm3 = vcmask 64512   ;;  %s569_s1 = inlined_call_operand.vmem [shape: f32[16,64], index: 1, kind: input, shape index: {}]   ;;  %s570_s0 = inlined_call_operand.vmem [shape: f32[32,16], index: 0, kind: input, shape index: {}]   ;;  %s571_s2 = inlined_call_operand.vmem [shape: f32[64,32], index: 2, kind: input, shape index: {}]   ;;  %s572_s3 = inlined_call_operand.vmem [shape: f32[32,8], index: 3, kind: input, shape index: {}]   ;;  %s573_s4 = inlined_call_operand.vmem [shape: f32[32,8], index: 4, kind: output, shape index: {}]  }
   0x1   :  { %v21_v0 = vld [vmem:[%s569_s1] sm:$0xff]  ;;  %v22_v1 = vld [vmem:[%s569_s1 + $0x8] sm:$0xff]  ;;  %v19_v8 = vld [vmem:[%s570_s0 + $0x10] sm:$0xff] }
   0x2   :  { %v17_v2 = vld [vmem:[%s570_s0] sm:$0xff]  ;;  %v430_v3 = vpack.c.bf16 %v22_v1, %v21_v0  ;;  %v126_v5 = vld [vmem:[%s571_s2 + $0x8] sm:$0xff]  ;;  %v20_v9 = vld [vmem:[%s570_s0 + $0x18] sm:$0xff] }
   0x3   :  { %388 = vmatprep.mubr.msk.f32.mxu0 %vm23_vm0, %v17_v2  ;;  %v125_v4 = vld [vmem:[%s571_s2] sm:$0xff]  ;;  %v18_v7 = vld [vmem:[%s570_s0 + $0x8] sm:$0xff]  ;;  %v127_v10 = vld [vmem:[%s571_s2 + $0x10] sm:$0xff] }
   0x4   :  { %431 = vmatprep.subr.bf16.mxu0 %v430_v3  ;;  %v434_v6 = vpack.c.bf16 %v126_v5, %v125_v4  ;;  %v128_v11 = vld [vmem:[%s571_s2 + $0x18] sm:$0xff]  ;;  %v129_v13 = vld [vmem:[%s571_s2 + $0x20] sm:$0xff]  ;;  %v130_v14 = vld [vmem:[%s571_s2 + $0x28] sm:$0xff] }
   0x5   :  { %433 = vmatpush3.bf16.msra.mxu0 %v430_v3  ;;  %v438_v12 = vpack.c.bf16 %v128_v11, %v127_v10  ;;  %v442_v15 = vpack.c.bf16 %v130_v14, %v129_v13  ;;  %v131_v16 = vld [vmem:[%s571_s2 + $0x30] sm:$0xff]  ;;  %v132_v17 = vld [vmem:[%s571_s2 + $0x38] sm:$0xff]  ;;  %v235_v27 = vld [vmem:[%s572_s3] sm:$0xff] }
   0x6   :  { %435 = vmatprep.subr.bf16.mxu1 %v434_v6  ;;  %v446_v18 = vpack.c.bf16 %v132_v17, %v131_v16  ;;  %v236_v28 = vld [vmem:[%s572_s3 + $0x8] sm:$0xff]  ;;  %v237_v30 = vld [vmem:[%s572_s3 + $0x10] sm:$0xff]  ;;  %v238_v31 = vld [vmem:[%s572_s3 + $0x18] sm:$0xff] }
   0x7   :  { %437 = vmatpush3.bf16.msra.mxu1 %v434_v6  ;;  %v450_v29 = vpack.c.bf16 %v236_v28, %v235_v27  ;;  %v454_v32 = vpack.c.bf16 %v238_v31, %v237_v30 }
   0x8   :  { %389 = vmatmul.mubr.msk.f32.vlgmr.msra.gmra.mrb[0].mxu0 %vm23_vm0, %v18_v7  ;;  %439 = vmatprep.subr.bf16.mxu1 %v438_v12 }
   0x9   :  { %391 = vmatprep.mubr.msk.f32.mxu0 %vm23_vm0, %v19_v8  ;;  %451 = vmatprep.subr.bf16.mxu0 %v450_v29 }
   0xa   :  { %453 = vmatpush3.bf16.msra.mxu0 %v450_v29 }
   0xb   :  { %441 = vmatpush3.bf16.msra.mxu1 %v438_v12  ;;  %455 = vmatprep.subr.bf16.mxu0 %v454_v32 }
   0xc   :  { %392 = vmatmul.mubr.msk.f32.gmra.mrb[2].mxu0 %vm23_vm0, %v20_v9  ;;  %443 = vmatprep.subr.bf16.mxu1 %v442_v15 }
   0xe   :  { %457 = vmatpush3.bf16.msra.mxu0 %v454_v32 }
   0xf   :  { %445 = vmatpush3.bf16.msra.mxu1 %v442_v15 }
  0x10   :  { %447 = vmatprep.subr.bf16.mxu1 %v446_v18 }
  0x13   :  { %449 = vmatpush3.bf16.msra.mxu1 %v446_v18 }
  0xdb   :  { %v390_v19 = vpop.f32.mrb[0].mxu0 }
  0xdc   :  { %v102_v20 = vpop.f32.mrb[1].mxu0 }
  0xdd   :  { %458 = vtanh.f32 %v102_v20 }
  0xde   :  { %460 = vtanh.f32 %v390_v19 }
  0xdf   :  { %v393_v21 = vpop.f32.mrb[2].mxu0 }
  0xe0   :  { %v112_v22 = vpop.f32.mrb[3].mxu0 }
  0xe1   :  { %462 = vtanh.f32 %v112_v22 }
  0xe2   :  { %464 = vtanh.f32 %v393_v21 }
  0xe7   :  { %v459_v23 = vpop.eup %458 }
  0xe8   :  { %v461_v24 = vpop.eup %460  ;;  %410 = vmatprep.mubr.msk.f32.mxu1 %vm133_vm1, %v459_v23 }
  0xe9   :  { %411 = vmatmul.mubr.msk.f32.vlgmr.msra.gmra.mrb[0].mxu1 %vm133_vm1, %v461_v24 }
  0xeb   :  { %v463_v25 = vpop.eup %462 }
  0xec   :  { %v465_v26 = vpop.eup %464  ;;  %413 = vmatprep.mubr.msk.f32.mxu1 %vm133_vm1, %v463_v25 }
  0xed   :  { %414 = vmatmul.mubr.msk.f32.gmra.mrb[2].mxu1 %vm133_vm1, %v465_v26 }
 0x1bc   :  { %v412_v33 = vpop.f32.mrb[0].mxu1 }
 0x1bd   :  { %v212_v34 = vpop.f32.mrb[1].mxu1 }
 0x1be   :  { %466 = vtanh.f32 %v212_v34 }
 0x1bf   :  { %468 = vtanh.f32 %v412_v33 }
 0x1c0   :  { %v415_v35 = vpop.f32.mrb[2].mxu1 }
 0x1c1   :  { %v222_v36 = vpop.f32.mrb[3].mxu1 }
 0x1c2   :  { %470 = vtanh.f32 %v222_v36 }
 0x1c3   :  { %472 = vtanh.f32 %v415_v35 }
 0x1c8   :  { %v467_v37 = vpop.eup %466 }
 0x1c9   :  { %v469_v38 = vpop.eup %468  ;;  %424 = vmatprep.mubr.msk.f32.mxu0 %vm239_vm2, %v467_v37 }
 0x1ca   :  { %425 = vmatmul.mubr.msk.f32.vlgmr.msra.gmra.mrb[4].mxu0 %vm239_vm2, %v469_v38 }
 0x1cc   :  { %v471_v39 = vpop.eup %470 }
 0x1cd   :  { %v473_v40 = vpop.eup %472  ;;  %427 = vmatprep.mubr.msk.f32.mxu0 %vm239_vm2, %v471_v39 }
 0x1ce   :  { %428 = vmatmul.mubr.msk.f32.gmra.mrb[6].mxu0 %vm239_vm2, %v473_v40 }
 0x29d   :  { %v426_v41 = vpop.f32.mrb[4].mxu0 }
 0x29e   :  { %339 = vst.msk [vmem:[%s573_s4 + $0x8] sm:$0xff] %vm337_vm3, %v426_v41  ;;  %v318_v42 = vpop.f32.mrb[5].mxu0 }
 0x29f   :  { %338 = vst.msk [vmem:[%s573_s4] sm:$0xff] %vm337_vm3, %v318_v42 }
 0x2a1   :  { %v429_v43 = vpop.f32.mrb[6].mxu0 }
 0x2a2   :  { %341 = vst.msk [vmem:[%s573_s4 + $0x18] sm:$0xff] %vm337_vm3, %v429_v43  ;;  %v328_v44 = vpop.f32.mrb[7].mxu0 }
 0x2a3   :  { %340 = vst.msk [vmem:[%s573_s4 + $0x10] sm:$0xff] %vm337_vm3, %v328_v44 }

</bundles_post_ra>
